<compile_context>
chip_gen: v7x
topology: tpu7x:2x2x1
jax: 0.10.0
libtpu: 0.0.40
codegen_flags: <defaults>
</compile_context>

<pallas_src>
import jax
import jax.numpy as jnp
from jax.experimental import pallas as pl
from jax.experimental.pallas import tpu as pltpu


def _round_up(n, m):
    return ((n + m - 1) // m) * m


def dqn_mlp_kernel(x_ref, w1_ref, b1_ref, w2_ref, b2_ref, w3_ref, b3_ref, o_ref):
    # Native bf16 x bf16 MXU path with f32 accumulation: cast the (small)
    # activations down, never the weights up.
    x = x_ref[...].astype(jnp.bfloat16)

    # Linear(state_size, 512) -> ReLU
    h1 = jnp.dot(x, w1_ref[...], preferred_element_type=jnp.float32)
    h1 = jnp.maximum(h1 + b1_ref[...], 0.0).astype(jnp.bfloat16)

    # Dropout(0.2): identity at inference (eval mode).

    # Linear(512, 256) -> ReLU
    h2 = jnp.dot(h1, w2_ref[...], preferred_element_type=jnp.float32)
    h2 = jnp.maximum(h2 + b2_ref[...], 0.0).astype(jnp.bfloat16)

    # Linear(256, action_size)  (action dim padded to a lane-dense 128)
    q = jnp.dot(h2, w3_ref[...], preferred_element_type=jnp.float32)
    o_ref[...] = (q + b3_ref[...]).astype(o_ref.dtype)


def dqn_forward(x, params, *, tile_b=None):
    """Run the DQN MLP forward pass as a single Pallas kernel.

    x: (B, state_size) float32
    params: dict with w1 (S,512), b1 (1,512), w2 (512,256), b2 (1,256),
            w3 (256,A), b3 (1,A).  Weights may be f32 or bf16; they are
            streamed to the kernel as bf16.
    """
    B, S = x.shape
    H1 = params["w1"].shape[1]
    H2 = params["w2"].shape[1]
    A = params["w3"].shape[1]

    # ---- batch tiling ------------------------------------------------------
    # Below ~1K rows the kernel is weight-DMA bound: use a single grid step so
    # the constant-index weights are fetched exactly once (no per-TC duplicate
    # fetch on v7x).  Only compute-bound batches are split into ~1024-row tiles
    # (amortizes ~0.35us/step overhead, feeds both v7x TCs, overlaps x DMA).
    if tile_b is None:
        if B <= 1024:
            tile_b = max(8, _round_up(B, 8))
        else:
            n_steps = pl.cdiv(B, 1024)
            tile_b = _round_up(pl.cdiv(B, n_steps), 8)
    else:
        tile_b = max(8, _round_up(min(tile_b, B), 8))
    B_pad = _round_up(B, tile_b)
    if B_pad != B:
        x = jnp.pad(x, ((0, B_pad - B), (0, 0)))

    # ---- lane-dense output: pad action dim to a multiple of 128 ------------
    A_pad = _round_up(A, 128)
    w3 = params["w3"]
    b3 = params["b3"]
    if A_pad != A:
        w3 = jnp.pad(w3, ((0, 0), (0, A_pad - A)))
        b3 = jnp.pad(b3, ((0, 0), (0, A_pad - A)))

    # Weights as bf16 (dominant HBM traffic + native MXU input); biases f32.
    w1 = params["w1"].astype(jnp.bfloat16)
    w2 = params["w2"].astype(jnp.bfloat16)
    w3 = w3.astype(jnp.bfloat16)
    b1 = params["b1"].astype(jnp.float32)
    b2 = params["b2"].astype(jnp.float32)
    b3 = b3.astype(jnp.float32)

    grid = (B_pad // tile_b,)

    def rep(shape):
        # Constant index_map -> the tile is fetched once per call; single-
        # buffer it so VMEM is not wasted on a pointless second buffer.
        return pl.BlockSpec(shape, lambda i: (0,) * len(shape),
                            pipeline_mode=pl.Buffered(1))

    weight_bytes = (S * H1 + H1 * H2 + H2 * A_pad) * 2
    bias_bytes = (H1 + H2 + A_pad) * 4
    flops = 2 * B_pad * (S * H1 + H1 * H2 + H2 * A_pad)
    bytes_accessed = (
        B_pad * S * 4            # x (f32)
        + weight_bytes           # weights (bf16), fetched once
        + bias_bytes             # biases (f32)
        + B_pad * A_pad * 4      # output (f32)
    )
    cost = pl.CostEstimate(flops=flops, transcendentals=0,
                           bytes_accessed=bytes_accessed)

    # Per-step VMEM footprint (double-buffered x/out, single-buffered weights,
    # bf16 activations + f32 pre-ReLU temporaries), with 2x headroom.
    footprint = (
        2 * tile_b * S * 4                 # x tiles (f32, double-buffered)
        + weight_bytes + bias_bytes        # resident weights/biases
        + 2 * tile_b * A_pad * 4           # out tiles (f32, double-buffered)
        + tile_b * (H1 + H2) * 6           # h1/h2: f32 pre-ReLU + bf16 copy
    )
    vmem_limit = min(max(_round_up(2 * footprint, 1 << 20), 8 << 20), 64 << 20)

    out = pl.pallas_call(
        dqn_mlp_kernel,
        out_shape=jax.ShapeDtypeStruct((B_pad, A_pad), jnp.float32),
        grid_spec=pltpu.PrefetchScalarGridSpec(
            num_scalar_prefetch=0,
            grid=grid,
            in_specs=[
                pl.BlockSpec((tile_b, S), lambda i: (i, 0)),
                rep((S, H1)),
                rep((1, H1)),
                rep((H1, H2)),
                rep((1, H2)),
                rep((H2, A_pad)),
                rep((1, A_pad)),
            ],
            out_specs=pl.BlockSpec((tile_b, A_pad), lambda i: (i, 0)),
        ),
        compiler_params=pltpu.CompilerParams(
            dimension_semantics=("parallel",),
            vmem_limit_bytes=vmem_limit,
        ),
        cost_estimate=cost,
    )(x, w1, b1, w2, b2, w3, b3)

    return out[:B, :A]


def init_params(key, state_size, action_size):
    """Deterministic init mimicking PyTorch nn.Linear default
    (U[-1/sqrt(fan_in), +1/sqrt(fan_in)]).  Weights are stored bf16 (what the
    kernel streams); biases stay f32."""
    dims = [(state_size, 512), (512, 256), (256, action_size)]
    params = {}
    keys = jax.random.split(key, 2 * len(dims))
    for idx, (fan_in, fan_out) in enumerate(dims):
        bound = 1.0 / jnp.sqrt(jnp.float32(fan_in))
        w = jax.random.uniform(keys[2 * idx], (fan_in, fan_out),
                               minval=-bound, maxval=bound, dtype=jnp.float32)
        b = jax.random.uniform(keys[2 * idx + 1], (1, fan_out),
                               minval=-bound, maxval=bound, dtype=jnp.float32)
        params[f"w{idx + 1}"] = w.astype(jnp.bfloat16)
        params[f"b{idx + 1}"] = b
    return params


def reference_forward(x, params):
    # Mirror the kernel numerics: bf16 weights AND bf16 activations into each
    # dot, f32 accumulation, f32 bias add / ReLU.
    w1 = params["w1"].astype(jnp.bfloat16)
    w2 = params["w2"].astype(jnp.bfloat16)
    w3 = params["w3"].astype(jnp.bfloat16)
    h1 = jnp.dot(x.astype(jnp.bfloat16), w1, preferred_element_type=jnp.float32)
    h1 = jnp.maximum(h1 + params["b1"], 0.0).astype(jnp.bfloat16)
    h2 = jnp.dot(h1, w2, preferred_element_type=jnp.float32)
    h2 = jnp.maximum(h2 + params["b2"], 0.0).astype(jnp.bfloat16)
    q = jnp.dot(h2, w3, preferred_element_type=jnp.float32)
    return q + params["b3"]


if __name__ == "__main__":
    state_size = 32
    action_size = 8
    batch = 8

    key = jax.random.PRNGKey(0)
    pkey, xkey = jax.random.split(key)
    params = init_params(pkey, state_size, action_size)
    x = jax.random.normal(xkey, (batch, state_size), dtype=jnp.float32)

    q = dqn_forward(x, params)
    q = jax.block_until_ready(q)

    q_ref = reference_forward(x, params)
    assert q.shape == (batch, action_size)
    assert jnp.allclose(q, q_ref, atol=5e-3, rtol=5e-3), float(
        jnp.max(jnp.abs(q - q_ref)))

    print("KERNEL_OK")
</pallas_src>

<mosaic_0001>
module attributes {stable_mosaic.version = 11 : i64} {
  func.func @dqn_mlp_kernel(%arg0: i32, %arg1: memref<8x32xf32, #tpu.memory_space<vmem>>, %arg2: memref<32x512xbf16, #tpu.memory_space<vmem>>, %arg3: memref<1x512xf32, #tpu.memory_space<vmem>>, %arg4: memref<512x256xbf16, #tpu.memory_space<vmem>>, %arg5: memref<1x256xf32, #tpu.memory_space<vmem>>, %arg6: memref<256x128xbf16, #tpu.memory_space<vmem>>, %arg7: memref<1x128xf32, #tpu.memory_space<vmem>>, %arg8: memref<8x128xf32, #tpu.memory_space<vmem>>) attributes {dimension_semantics = [#tpu.dimension_semantics<parallel>], iteration_bounds = array<i64: 1>, scalar_prefetch = 0 : i64, scratch_operands = 0 : i64, tpu.core_type = #tpu.core_type<tc>, window_params = [{transform_indices = @transform_0, window_bounds = array<i64: 8, 32>}, {pipeline_mode = #tpu.pipeline_mode<synchronous>, transform_indices = @transform_1, window_bounds = array<i64: 32, 512>}, {pipeline_mode = #tpu.pipeline_mode<synchronous>, transform_indices = @transform_2, window_bounds = array<i64: 1, 512>}, {pipeline_mode = #tpu.pipeline_mode<synchronous>, transform_indices = @transform_3, window_bounds = array<i64: 512, 256>}, {pipeline_mode = #tpu.pipeline_mode<synchronous>, transform_indices = @transform_4, window_bounds = array<i64: 1, 256>}, {pipeline_mode = #tpu.pipeline_mode<synchronous>, transform_indices = @transform_5, window_bounds = array<i64: 256, 128>}, {pipeline_mode = #tpu.pipeline_mode<synchronous>, transform_indices = @transform_6, window_bounds = array<i64: 1, 128>}, {transform_indices = @transform_7, window_bounds = array<i64: 8, 128>}]} {
    %c0 = arith.constant 0 : index
    %c0_0 = arith.constant 0 : index
    %0 = vector.load %arg1[%c0, %c0_0] : memref<8x32xf32, #tpu.memory_space<vmem>>, vector<8x32xf32>
    %1 = arith.truncf %0 : vector<8x32xf32> to vector<8x32xbf16>
    %c0_1 = arith.constant 0 : index
    %c0_2 = arith.constant 0 : index
    %2 = vector.load %arg2[%c0_1, %c0_2] : memref<32x512xbf16, #tpu.memory_space<vmem>>, vector<32x512xbf16>
    %cst = arith.constant dense<0.000000e+00> : vector<8x512xf32>
    %3 = tpu.matmul %1, %2, %cst {dimension_numbers = #tpu.dot_dimension_numbers<[1], [0], [0], [1], [0, 0, 1, 1], [], []>} : vector<8x32xbf16>, vector<32x512xbf16>, vector<8x512xf32> -> vector<8x512xf32>
    %c0_3 = arith.constant 0 : index
    %c0_4 = arith.constant 0 : index
    %4 = vector.load %arg3[%c0_3, %c0_4] : memref<1x512xf32, #tpu.memory_space<vmem>>, vector<1x512xf32>
    %5 = vector.broadcast %4 : vector<1x512xf32> to vector<8x512xf32>
    %6 = arith.addf %3, %5 : vector<8x512xf32>
    %cst_5 = arith.constant 0.000000e+00 : f32
    %7 = vector.broadcast %cst_5 : f32 to vector<8x512xf32>
    %8 = arith.maximumf %6, %7 : vector<8x512xf32>
    %9 = arith.truncf %8 : vector<8x512xf32> to vector<8x512xbf16>
    %c0_6 = arith.constant 0 : index
    %c0_7 = arith.constant 0 : index
    %10 = vector.load %arg4[%c0_6, %c0_7] : memref<512x256xbf16, #tpu.memory_space<vmem>>, vector<512x256xbf16>
    %cst_8 = arith.constant dense<0.000000e+00> : vector<8x256xf32>
    %11 = tpu.matmul %9, %10, %cst_8 {dimension_numbers = #tpu.dot_dimension_numbers<[1], [0], [0], [1], [0, 0, 1, 1], [], []>} : vector<8x512xbf16>, vector<512x256xbf16>, vector<8x256xf32> -> vector<8x256xf32>
    %c0_9 = arith.constant 0 : index
    %c0_10 = arith.constant 0 : index
    %12 = vector.load %arg5[%c0_9, %c0_10] : memref<1x256xf32, #tpu.memory_space<vmem>>, vector<1x256xf32>
    %13 = vector.broadcast %12 : vector<1x256xf32> to vector<8x256xf32>
    %14 = arith.addf %11, %13 : vector<8x256xf32>
    %cst_11 = arith.constant 0.000000e+00 : f32
    %15 = vector.broadcast %cst_11 : f32 to vector<8x256xf32>
    %16 = arith.maximumf %14, %15 : vector<8x256xf32>
    %17 = arith.truncf %16 : vector<8x256xf32> to vector<8x256xbf16>
    %c0_12 = arith.constant 0 : index
    %c0_13 = arith.constant 0 : index
    %18 = vector.load %arg6[%c0_12, %c0_13] : memref<256x128xbf16, #tpu.memory_space<vmem>>, vector<256x128xbf16>
    %cst_14 = arith.constant dense<0.000000e+00> : vector<8x128xf32>
    %19 = tpu.matmul %17, %18, %cst_14 {dimension_numbers = #tpu.dot_dimension_numbers<[1], [0], [0], [1], [0, 0, 1, 1], [], []>} : vector<8x256xbf16>, vector<256x128xbf16>, vector<8x128xf32> -> vector<8x128xf32>
    %c0_15 = arith.constant 0 : index
    %c0_16 = arith.constant 0 : index
    %20 = vector.load %arg7[%c0_15, %c0_16] : memref<1x128xf32, #tpu.memory_space<vmem>>, vector<1x128xf32>
    %21 = vector.broadcast %20 : vector<1x128xf32> to vector<8x128xf32>
    %22 = arith.addf %19, %21 : vector<8x128xf32>
    %c0_17 = arith.constant 0 : index
    %c0_18 = arith.constant 0 : index
    %23 = vector.load %arg8[%c0_17, %c0_18] : memref<8x128xf32, #tpu.memory_space<vmem>>, vector<8x128xf32>
    tpu.vector_store %arg8[%c0_17, %c0_18], %22 {strides = array<i32>} : memref<8x128xf32, #tpu.memory_space<vmem>>, vector<8x128xf32>,
    return
  }
  func.func @transform_0(%arg0: i32) -> (i32, i32) {
    %c0_i32 = arith.constant 0 : i32
    %c0_i32_0 = arith.constant 0 : i32
    return %arg0, %c0_i32 : i32, i32
  }
  func.func @transform_1(%arg0: i32) -> (i32, i32) {
    %c0_i32 = arith.constant 0 : i32
    %c0_i32_0 = arith.constant 0 : i32
    %c0_i32_1 = arith.constant 0 : i32
    return %c0_i32, %c0_i32_0 : i32, i32
  }
  func.func @transform_2(%arg0: i32) -> (i32, i32) {
    %c0_i32 = arith.constant 0 : i32
    %c0_i32_0 = arith.constant 0 : i32
    %c0_i32_1 = arith.constant 0 : i32
    return %c0_i32, %c0_i32_0 : i32, i32
  }
  func.func @transform_3(%arg0: i32) -> (i32, i32) {
    %c0_i32 = arith.constant 0 : i32
    %c0_i32_0 = arith.constant 0 : i32
    %c0_i32_1 = arith.constant 0 : i32
    return %c0_i32, %c0_i32_0 : i32, i32
  }
  func.func @transform_4(%arg0: i32) -> (i32, i32) {
    %c0_i32 = arith.constant 0 : i32
    %c0_i32_0 = arith.constant 0 : i32
    %c0_i32_1 = arith.constant 0 : i32
    return %c0_i32, %c0_i32_0 : i32, i32
  }
  func.func @transform_5(%arg0: i32) -> (i32, i32) {
    %c0_i32 = arith.constant 0 : i32
    %c0_i32_0 = arith.constant 0 : i32
    %c0_i32_1 = arith.constant 0 : i32
    return %c0_i32, %c0_i32_0 : i32, i32
  }
  func.func @transform_6(%arg0: i32) -> (i32, i32) {
    %c0_i32 = arith.constant 0 : i32
    %c0_i32_0 = arith.constant 0 : i32
    %c0_i32_1 = arith.constant 0 : i32
    return %c0_i32, %c0_i32_0 : i32, i32
  }
  func.func @transform_7(%arg0: i32) -> (i32, i32) {
    %c0_i32 = arith.constant 0 : i32
    %c0_i32_0 = arith.constant 0 : i32
    return %arg0, %c0_i32 : i32, i32
  }
}

</mosaic_0001>

<bundles_post_ra>
// kernel: tpu_custom_call.1
= control target key start
LH: loop header
LB: loop body
LE: loop exit
PB: predicated region body
PF: predicated region fallthrough
CT: control target
= control target key end

     0   :  { %12 = vsyncpa [#allocation3], 0  ;;  %s1430_s0 = inlined_call_operand.hbm [shape: f32[8,32], index: 0, kind: input, shape index: {}]   ;;  %s1431_s1 = inlined_call_operand.hbm [shape: bf16[32,512], index: 1, kind: input, shape index: {}]   ;;  %s1432_s2 = inlined_call_operand.vmem [shape: f32[1,512], index: 2, kind: input, shape index: {}]   ;;  %s1433_s3 = inlined_call_operand.hbm [shape: bf16[512,256], index: 3, kind: input, shape index: {}]   ;;  %s1434_s4 = inlined_call_operand.vmem [shape: f32[1,256], index: 4, kind: input, shape index: {}]   ;;  %s1435_s5 = inlined_call_operand.hbm [shape: bf16[256,128], index: 5, kind: input, shape index: {}]   ;;  %s1436_s6 = inlined_call_operand.vmem [shape: f32[1,128], index: 6, kind: input, shape index: {}]   ;;  %s1437_s7 = inlined_call_operand.hbm [shape: f32[8,128], index: 7, kind: output, shape index: {}]  }
   0x1   :  { %13 = vsyncpa [#allocation6], 0 }
   0x2   :  { %14 = vsyncpa [#allocation9], 0 }
   0x3   :  { %15 = vsyncpa [#allocation4], 0  ;;  %s1293_s24 = smov [#allocation5]   ;;  %s1175_s28 = scalar_lea.hbm %s1431_s1, 1024 }
   0x4   :  { %s31_s25 = sshll.u32 %s1293_s24, 4  ;;  %p1176_p0 = scmp.ne.s32.totalorder %s1431_s1, %s1175_s28  ;;  %s32_s25 = int_to_ptr.vmem [resolvable:$true] %s31_s25 }
   0x5   :  { %p1179_p1 = scmp.lt.u32.totalorder %s1175_s28, %s1431_s1 }
   0x7   :  { %p1181_p2 = pnand %p1179_p1, %p1176_p0 }
   0x9   :  { %1184 = shalt.err (!%p1181_p2)
}
   0xa   :  { %s1185_s10 = scalar_lea.vmem %s32_s25, 1024  ;;  %p1190_p4 = scmp.lt.s32.totalorder %s32_s25, %s32_s25 }
   0xb   :  { %p1186_p3 = scmp.ne.s32.totalorder %s32_s25, %s1185_s10  ;;  %p1191_p5 = scmp.lt.s32.totalorder %s1185_s10, %s1185_s10 }
   0xd   :  { %p1192_p6 = por %p1191_p5, %p1190_p4 }
   0xf   :  { %p1193_p7 = pnand %p1192_p6, %p1186_p3 }
  0x11   :  { %1196 = shalt.err (!%p1193_p7)
}
  0x12   :  { %s1294_s11 = smov 256   ;;  %s1295_s12 = smov 16  }
  0x13   :  { %37 = dma.hbm_to_vmem [thread:$0]  %s1431_s1, 1024, %s32_s25, [#allocation6], %s1294_s11, %s1294_s11, %s1295_s12  }
  0x14   :  { %s1296_s15 = smov [#allocation2]   ;;  %s1297_s17 = smov [#allocation7]  }
  0x15   :  { %s22_s16 = sshll.u32 %s1296_s15, 4  ;;  %s45_s18 = sshll.u32 %s1297_s17, 4  ;;  %s23_s16 = int_to_ptr.vmem [resolvable:$true] %s22_s16  ;;  %s46_s18 = int_to_ptr.vmem [resolvable:$true] %s45_s18 }
  0x16   :  { %s1197_s21 = scalar_lea.hbm %s1430_s0, 128 }
  0x17   :  { %p1198_p8 = scmp.ne.s32.totalorder %s1430_s0, %s1197_s21  ;;  %p1201_p9 = scmp.lt.u32.totalorder %s1197_s21, %s1430_s0 }
  0x19   :  { %p1203_p10 = pnand %p1201_p9, %p1198_p8 }
  0x1b   :  { %1206 = shalt.err (!%p1203_p10)
}
  0x1c   :  { %s1207_s1 = scalar_lea.vmem %s23_s16, 128  ;;  %p1212_p12 = scmp.lt.s32.totalorder %s23_s16, %s23_s16 }
  0x1d   :  { %p1208_p11 = scmp.ne.s32.totalorder %s23_s16, %s1207_s1  ;;  %p1213_p13 = scmp.lt.s32.totalorder %s1207_s1, %s1207_s1 }
  0x1f   :  { %p1214_p0 = por %p1213_p13, %p1212_p12 }
  0x21   :  { %p1215_p1 = pnand %p1214_p0, %p1208_p11 }
  0x23   :  { %1218 = shalt.err (!%p1215_p1)
}
  0x24   :  { %25 = dma.hbm_to_vmem [thread:$0]  %s1430_s0, 128, %s23_s16, [#allocation3]  }
  0x25   :  { %s1219_s30 = scalar_lea.hbm %s1433_s3, 8192 }
  0x26   :  { %p1220_p2 = scmp.ne.s32.totalorder %s1433_s3, %s1219_s30  ;;  %p1223_p3 = scmp.lt.u32.totalorder %s1219_s30, %s1433_s3 }
  0x28   :  { %p1225_p4 = pnand %p1223_p3, %p1220_p2 }
  0x2a   :  { %1228 = shalt.err (!%p1225_p4)
}
  0x2b   :  { %s1229_s12 = scalar_lea.vmem %s46_s18, 8192  ;;  %p1234_p6 = scmp.lt.s32.totalorder %s46_s18, %s46_s18 }
  0x2c   :  { %p1230_p5 = scmp.ne.s32.totalorder %s46_s18, %s1229_s12  ;;  %p1235_p7 = scmp.lt.s32.totalorder %s1229_s12, %s1229_s12 }
  0x2e   :  { %p1236_p8 = por %p1235_p7, %p1234_p6 }
  0x30   :  { %p1237_p9 = pnand %p1236_p8, %p1230_p5 }
  0x32   :  { %1240 = shalt.err (!%p1237_p9)
}
  0x33   :  { %s1298_s0 = smov 128   ;;  %s1299_s13 = smov 8  }
  0x34   :  { %51 = dma.hbm_to_vmem [thread:$0]  %s1433_s3, 8192, %s46_s18, [#allocation6], %s1298_s0, %s1298_s0, %s1299_s13  }
  0x35   :  { %s1300_s16 = smov [#allocation8]   ;;  %s1241_s21 = scalar_lea.hbm %s1435_s5, 2048 }
  0x36   :  { %s59_s17 = sshll.u32 %s1300_s16, 4  ;;  %p1242_p10 = scmp.ne.s32.totalorder %s1435_s5, %s1241_s21  ;;  %s60_s17 = int_to_ptr.vmem [resolvable:$true] %s59_s17 }
  0x37   :  { %p1245_p11 = scmp.lt.u32.totalorder %s1241_s21, %s1435_s5 }
  0x39   :  { %p1247_p12 = pnand %p1245_p11, %p1242_p10 }
  0x3b   :  { %1250 = shalt.err (!%p1247_p12)
}
  0x3c   :  { %s1251_s1 = scalar_lea.vmem %s60_s17, 2048  ;;  %p1256_p0 = scmp.lt.s32.totalorder %s60_s17, %s60_s17 }
  0x3d   :  { %p1252_p13 = scmp.ne.s32.totalorder %s60_s17, %s1251_s1  ;;  %p1257_p1 = scmp.lt.s32.totalorder %s1251_s1, %s1251_s1 }
  0x3f   :  { %p1258_p2 = por %p1257_p1, %p1256_p0 }
  0x41   :  { %p1259_p3 = pnand %p1258_p2, %p1252_p13 }
  0x43   :  { %1262 = shalt.err (!%p1259_p3)
}
  0x44   :  { %s1301_s3 = smov 64   ;;  %s1302_s18 = smov 4  }
  0x45   :  { %65 = dma.hbm_to_vmem [thread:$0]  %s1435_s5, 2048, %s60_s17, [#allocation9], %s1301_s3, %s1301_s3, %s1302_s18  }
  0x46   :  { %1285 = dma.done.wait [#allocation3], 128  }
  0x47   :  { %1286 = vsyncadd [#allocation3], 4294967168 }
  0x48   :  { %1287 = dma.done.wait [#allocation6], 9216  }
  0x49   :  { %1288 = vsyncadd [#allocation6], 4294958080 }
  0x4a   :  { %1289 = dma.done.wait [#allocation9], 2048  }
  0x4b   :  { %1290 = vsyncadd [#allocation9], 4294965248  ;;  %v1303_v0 = vmov 0   ;;  %v1051_v1 = vld [vmem:[#allocation5 + $0x4] ss:$16 sps:$4 sm:$0xff]   ;;  %v81_v5 = vld [vmem:[#allocation2] sm:$0xff] }
  0x4c   :  { %189 = vmatprep.mubr.bf16.mxu0 %v1303_v0  ;;  %v1053_v2 = vld [vmem:[#allocation5] ss:$16 sps:$4 sm:$0xff]   ;;  %157 = vmatprep.subr.bf16.mxu0 %v1051_v1  ;;  %v1054_v3 = vld [vmem:[#allocation5 + $0x24] ss:$16 sps:$4 sm:$0xff]   ;;  %v1059_v6 = vld [vmem:[#allocation5 + $0xc] ss:$16 sps:$4 sm:$0xff]   ;;  %v82_v8 = vpack.c.bf16 %v81_v5, %v81_v5 }
  0x4d   :  { %v1056_v4 = vld [vmem:[#allocation5 + $0x20] ss:$16 sps:$4 sm:$0xff]   ;;  %158 = vmatpush1.bf16.msra.mxu0 %v1053_v2  ;;  %v1057_v7 = vld [vmem:[#allocation5 + $0x8] ss:$16 sps:$4 sm:$0xff]   ;;  %v1063_v9 = vld [vmem:[#allocation7 + $0x4] ss:$8 sps:$4 sm:$0xff]  }
  0x4e   :  { %159 = vmatprep.subr.bf16.mxu0 %v1054_v3  ;;  %v1065_v10 = vld [vmem:[#allocation7] ss:$8 sps:$4 sm:$0xff]   ;;  %vm153_vm0 = vcmask 261120   ;;  %v1066_v11 = vld [vmem:[#allocation7 + $0x14] ss:$8 sps:$4 sm:$0xff]   ;;  %643 = vmatprep.subr.bf16.mxu1 %v1063_v9  ;;  %s1304_s8 = smov [#allocation10]  }
  0x4f   :  { %v1062_v12 = vld [vmem:[#allocation5 + $0x2c] ss:$16 sps:$4 sm:$0xff]   ;;  %644 = vmatpush1.bf16.msra.mxu1 %v1065_v10  ;;  %v1068_v13 = vld [vmem:[#allocation7 + $0x10] ss:$8 sps:$4 sm:$0xff]   ;;  %v1074_v17 = vld [vmem:[#allocation7 + $0x20] ss:$8 sps:$4 sm:$0xff]  }
  0x50   :  { %645 = vmatprep.subr.bf16.mxu1 %v1066_v11  ;;  %v1069_v14 = vld [vmem:[#allocation7 + $0x24] ss:$8 sps:$4 sm:$0xff]   ;;  %v1060_v15 = vld [vmem:[#allocation5 + $0x28] ss:$16 sps:$4 sm:$0xff]   ;;  %v1075_v18 = vld [vmem:[#allocation7 + $0x34] ss:$8 sps:$4 sm:$0xff]  }
  0x51   :  { %160 = vmatpush1.bf16.msra.mxu0 %v1056_v4  ;;  %v1073_v16 = vld [vmem:[#allocation7 + $0x104] ss:$8 sps:$4 sm:$0xff]   ;;  %v1071_v19 = vld [vmem:[#allocation7 + $0x100] ss:$8 sps:$4 sm:$0xff]   ;;  %v1079_v20 = vld [vmem:[#allocation7 + $0x114] ss:$8 sps:$4 sm:$0xff]  }
  0x52   :  { %198 = vmatprep.subr.bf16.mxu0 %v1059_v6  ;;  %v1080_v21 = vld [vmem:[#allocation7 + $0x30] ss:$8 sps:$4 sm:$0xff]   ;;  %v1081_v22 = vld [vmem:[#allocation7 + $0x44] ss:$8 sps:$4 sm:$0xff]   ;;  %v1086_v25 = vld [vmem:[#allocation7 + $0x40] ss:$8 sps:$4 sm:$0xff]  }
  0x53   :  { %646 = vmatpush1.bf16.msra.mxu1 %v1068_v13  ;;  %v1077_v23 = vld [vmem:[#allocation7 + $0x110] ss:$8 sps:$4 sm:$0xff]   ;;  %v1085_v24 = vld [vmem:[#allocation7 + $0x124] ss:$8 sps:$4 sm:$0xff]   ;;  %v1087_v26 = vld [vmem:[#allocation7 + $0x54] ss:$8 sps:$4 sm:$0xff]  }
  0x54   :  { %930 = vmatmul.mubr.msk.bf16.vlgmr.msra.gmra.mrb[0].mxu0 %vm153_vm0, %v82_v8  ;;  %647 = vmatprep.subr.bf16.mxu1 %v1069_v14  ;;  %v1083_v27 = vld [vmem:[#allocation7 + $0x120] ss:$8 sps:$4 sm:$0xff]   ;;  %v1091_v28 = vld [vmem:[#allocation7 + $0x134] ss:$8 sps:$4 sm:$0xff]   ;;  %v1092_v29 = vld [vmem:[#allocation7 + $0x50] ss:$8 sps:$4 sm:$0xff]  }
  0x55   :  { %199 = vmatpush1.bf16.msra.mxu0 %v1057_v7  ;;  %230 = vmatprep.mubr.bf16.mxu0 %v1303_v0  ;;  %v1093_v30 = vld [vmem:[#allocation7 + $0x64] ss:$8 sps:$4 sm:$0xff]   ;;  %v1089_v31 = vld [vmem:[#allocation7 + $0x130] ss:$8 sps:$4 sm:$0xff]   ;;  %v1098_v33 = vld [vmem:[#allocation7 + $0x60] ss:$8 sps:$4 sm:$0xff]  }
  0x56   :  { %200 = vmatprep.subr.bf16.mxu0 %v1062_v12  ;;  %v1097_v32 = vld [vmem:[#allocation7 + $0x144] ss:$8 sps:$4 sm:$0xff]   ;;  %v1099_v34 = vld [vmem:[#allocation7 + $0x74] ss:$8 sps:$4 sm:$0xff]   ;;  %v1095_v35 = vld [vmem:[#allocation7 + $0x140] ss:$8 sps:$4 sm:$0xff]   ;;  %v93_v12 = vlaneseq }
  0x57   :  { %648 = vmatpush1.bf16.msra.mxu1 %v1074_v17  ;;  %v1103_v36 = vld [vmem:[#allocation7 + $0x154] ss:$8 sps:$4 sm:$0xff]   ;;  %v1104_v37 = vld [vmem:[#allocation7 + $0x70] ss:$8 sps:$4 sm:$0xff]   ;;  %v1105_v38 = vld [vmem:[#allocation7 + $0x84] ss:$8 sps:$4 sm:$0xff]  }
  0x58   :  { %649 = vmatprep.subr.bf16.mxu1 %v1075_v18  ;;  %v1101_v39 = vld [vmem:[#allocation7 + $0x150] ss:$8 sps:$4 sm:$0xff]   ;;  %v1109_v40 = vld [vmem:[#allocation7 + $0x164] ss:$8 sps:$4 sm:$0xff]   ;;  %v1110_v41 = vld [vmem:[#allocation7 + $0x80] ss:$8 sps:$4 sm:$0xff]  }
  0x59   :  { %201 = vmatpush1.bf16.msra.mxu0 %v1060_v15  ;;  %v1111_v42 = vld [vmem:[#allocation7 + $0x94] ss:$8 sps:$4 sm:$0xff]   ;;  %v1107_v43 = vld [vmem:[#allocation7 + $0x160] ss:$8 sps:$4 sm:$0xff]   ;;  %v1116_v45 = vld [vmem:[#allocation7 + $0x90] ss:$8 sps:$4 sm:$0xff]  }
  0x5a   :  { %684 = vmatprep.subr.bf16.mxu0 %v1073_v16  ;;  %v1115_v44 = vld [vmem:[#allocation7 + $0x174] ss:$8 sps:$4 sm:$0xff]   ;;  %v1117_v46 = vld [vmem:[#allocation7 + $0xa4] ss:$8 sps:$4 sm:$0xff]   ;;  %v1113_v47 = vld [vmem:[#allocation7 + $0x170] ss:$8 sps:$4 sm:$0xff]  }
  0x5b   :  { %650 = vmatpush1.bf16.msra.mxu1 %v1080_v21  ;;  %v1121_v48 = vld [vmem:[#allocation7 + $0x184] ss:$8 sps:$4 sm:$0xff]   ;;  %v1122_v49 = vld [vmem:[#allocation7 + $0xa0] ss:$8 sps:$4 sm:$0xff]   ;;  %v1123_v50 = vld [vmem:[#allocation7 + $0xb4] ss:$8 sps:$4 sm:$0xff]  }
  0x5c   :  { %931 = vmatmul.mubr.msk.bf16.vlgmr.msra.gmra.mrb[4].mxu0 %vm153_vm0, %v82_v8  ;;  %651 = vmatprep.subr.bf16.mxu1 %v1081_v22  ;;  %v1119_v51 = vld [vmem:[#allocation7 + $0x180] ss:$8 sps:$4 sm:$0xff]   ;;  %v1127_v52 = vld [vmem:[#allocation7 + $0x194] ss:$8 sps:$4 sm:$0xff]   ;;  %v1128_v53 = vld [vmem:[#allocation7 + $0xb0] ss:$8 sps:$4 sm:$0xff]  }
  0x5d   :  { %685 = vmatpush1.bf16.msra.mxu0 %v1071_v19  ;;  %v1129_v54 = vld [vmem:[#allocation7 + $0xc4] ss:$8 sps:$4 sm:$0xff]   ;;  %v1125_v55 = vld [vmem:[#allocation7 + $0x190] ss:$8 sps:$4 sm:$0xff]   ;;  %v1134_v57 = vld [vmem:[#allocation7 + $0xc0] ss:$8 sps:$4 sm:$0xff]  }
  0x5e   :  { %686 = vmatprep.subr.bf16.mxu0 %v1079_v20  ;;  %v1133_v56 = vld [vmem:[#allocation7 + $0x1a4] ss:$8 sps:$4 sm:$0xff]   ;;  %v1135_v58 = vld [vmem:[#allocation7 + $0xd4] ss:$8 sps:$4 sm:$0xff]   ;;  %v1131_v59 = vld [vmem:[#allocation7 + $0x1a0] ss:$8 sps:$4 sm:$0xff]  }
  0x5f   :  { %652 = vmatpush1.bf16.msra.mxu1 %v1086_v25  ;;  %v1139_v60 = vld [vmem:[#allocation7 + $0x1b4] ss:$8 sps:$4 sm:$0xff]   ;;  %v1140_v61 = vld [vmem:[#allocation7 + $0xd0] ss:$8 sps:$4 sm:$0xff]   ;;  %v1141_v63 = vld [vmem:[#allocation7 + $0xe4] ss:$8 sps:$4 sm:$0xff]  }
  0x60   :  { %653 = vmatprep.subr.bf16.mxu1 %v1087_v26  ;;  %v1137_v62 = vld [vmem:[#allocation7 + $0x1b0] ss:$8 sps:$4 sm:$0xff]   ;;  %v1145_v0 = vld [vmem:[#allocation7 + $0x1c4] ss:$8 sps:$4 sm:$0xff]   ;;  %v1143_v1 = vld [vmem:[#allocation7 + $0x1c0] ss:$8 sps:$4 sm:$0xff]  }
  0x61   :  { %687 = vmatpush1.bf16.msra.mxu0 %v1077_v23  ;;  %v1146_v2 = vld [vmem:[#allocation7 + $0xe0] ss:$8 sps:$4 sm:$0xff]   ;;  %v1147_v3 = vld [vmem:[#allocation7 + $0xf4] ss:$8 sps:$4 sm:$0xff]   ;;  %v1149_v5 = vld [vmem:[#allocation7 + $0x1d0] ss:$8 sps:$4 sm:$0xff]  }
  0x62   :  { %688 = vmatprep.subr.bf16.mxu0 %v1085_v24  ;;  %v1151_v4 = vld [vmem:[#allocation7 + $0x1d4] ss:$8 sps:$4 sm:$0xff]   ;;  %v1152_v6 = vld [vmem:[#allocation7 + $0xf0] ss:$8 sps:$4 sm:$0xff]   ;;  %v1155_v7 = vld [vmem:[#allocation7 + $0x1e4] ss:$8 sps:$4 sm:$0xff]  }
  0x63   :  { %654 = vmatpush1.bf16.msra.mxu1 %v1092_v29  ;;  %v1153_v8 = vld [vmem:[#allocation7 + $0x1e0] ss:$8 sps:$4 sm:$0xff]   ;;  %v1158_v9 = vld [vmem:[#allocation7 + $0x1f4] ss:$8 sps:$4 sm:$0xff]   ;;  %v1156_v10 = vld [vmem:[#allocation7 + $0x1f0] ss:$8 sps:$4 sm:$0xff]  }
  0x64   :  { %655 = vmatprep.subr.bf16.mxu1 %v1093_v30  ;;  %v1159_v11 = vld [vmem:[#allocation8 + $0x40] sm:$0xff]   ;;  %v1395_v13 = vshrl.u32 %v93_v12, 7  ;;  %v91_v15 = vld [vmem:[%s1432_s2] sm:$0xf]  ;;  %s911_s9 = sshll.u32 %s1304_s8, 4  ;;  %s912_s9 = int_to_ptr.vmem [resolvable:$true] %s911_s9 }
  0x65   :  { %689 = vmatpush1.bf16.msra.mxu0 %v1083_v27  ;;  %s1263_s10 = scalar_lea.vmem %s912_s9, 128  ;;  %p1268_p5 = scmp.lt.s32.totalorder %s912_s9, %s912_s9 }
  0x66   :  { %690 = vmatprep.subr.bf16.mxu0 %v1091_v28  ;;  %v95_v14 = vsub.s32 0, %v1395_v13  ;;  %v99_v16 = vsub.s32 1, %v1395_v13  ;;  %v103_v22 = vsub.s32 2, %v1395_v13  ;;  %v107_v25 = vsub.s32 3, %v1395_v13  ;;  %v996_v13 = vld [vmem:[%s1436_s6] ss:$0 sm:$0xff]  ;;  %p1264_p4 = scmp.ne.s32.totalorder %s912_s9, %s1263_s10  ;;  %p1269_p6 = scmp.lt.s32.totalorder %s1263_s10, %s1263_s10 }
  0x67   :  { %656 = vmatpush1.bf16.msra.mxu1 %v1098_v33 }
  0x68   :  { %657 = vmatprep.subr.bf16.mxu1 %v1099_v34  ;;  %v96_v17 = vrot.slane %v91_v15, %v95_v14  ;;  %v100_v18 = vrot.slane %v91_v15, %v99_v16  ;;  %v104_v29 = vrot.slane %v91_v15, %v103_v22  ;;  %v1161_v34 = vld [vmem:[#allocation8 + $0x48] sm:$0xff]   ;;  %p1270_p7 = por %p1269_p6, %p1268_p5 }
  0x69   :  { %691 = vmatpush1.bf16.msra.mxu0 %v1089_v31  ;;  %v108_v31 = vrot.slane %v91_v15, %v107_v25 }
  0x6a   :  { %692 = vmatprep.subr.bf16.mxu0 %v1097_v32  ;;  %v1160_v32 = vld [vmem:[#allocation8] sm:$0xff]   ;;  %p1271_p8 = pnand %p1270_p7, %p1264_p4 }
  0x6b   :  { %658 = vmatpush1.bf16.msra.mxu1 %v1104_v37 }
  0x6c   :  { %659 = vmatprep.subr.bf16.mxu1 %v1105_v38 }
  0x6d   :  { %693 = vmatpush1.bf16.msra.mxu0 %v1095_v35 }
  0x6e   :  { %694 = vmatprep.subr.bf16.mxu0 %v1103_v36 }
  0x6f   :  { %660 = vmatpush1.bf16.msra.mxu1 %v1110_v41 }
  0x70   :  { %661 = vmatprep.subr.bf16.mxu1 %v1111_v42 }
  0x71   :  { %695 = vmatpush1.bf16.msra.mxu0 %v1101_v39 }
  0x72   :  { %696 = vmatprep.subr.bf16.mxu0 %v1109_v40  ;;  %v1162_v40 = vld [vmem:[#allocation8 + $0x8] sm:$0xff]  }
  0x73   :  { %662 = vmatpush1.bf16.msra.mxu1 %v1116_v45 }
  0x74   :  { %663 = vmatprep.subr.bf16.mxu1 %v1117_v46  ;;  %v1164_v46 = vld [vmem:[#allocation8 + $0x10] sm:$0xff]  }
  0x75   :  { %697 = vmatpush1.bf16.msra.mxu0 %v1107_v43  ;;  %v1163_v43 = vld [vmem:[#allocation8 + $0x50] sm:$0xff]  }
  0x76   :  { %698 = vmatprep.subr.bf16.mxu0 %v1115_v44 }
  0x77   :  { %664 = vmatpush1.bf16.msra.mxu1 %v1122_v49  ;;  %v1166_v49 = vld [vmem:[#allocation8 + $0x18] sm:$0xff]  }
  0x78   :  { %665 = vmatprep.subr.bf16.mxu1 %v1123_v50  ;;  %v1167_v50 = vld [vmem:[#allocation8 + $0x60] sm:$0xff]  }
  0x79   :  { %699 = vmatpush1.bf16.msra.mxu0 %v1113_v47 }
  0x7a   :  { %700 = vmatprep.subr.bf16.mxu0 %v1121_v48  ;;  %v1165_v48 = vld [vmem:[#allocation8 + $0x58] sm:$0xff]  }
  0x7b   :  { %666 = vmatpush1.bf16.msra.mxu1 %v1128_v53  ;;  %v1170_v53 = vld [vmem:[#allocation8 + $0x28] sm:$0xff]  }
  0x7c   :  { %667 = vmatprep.subr.bf16.mxu1 %v1129_v54  ;;  %v1171_v54 = vld [vmem:[#allocation8 + $0x70] sm:$0xff]  }
  0x7d   :  { %701 = vmatpush1.bf16.msra.mxu0 %v1119_v51  ;;  %v1168_v51 = vld [vmem:[#allocation8 + $0x20] sm:$0xff]  }
  0x7e   :  { %702 = vmatprep.subr.bf16.mxu0 %v1127_v52  ;;  %v1169_v52 = vld [vmem:[#allocation8 + $0x68] sm:$0xff]  }
  0x7f   :  { %668 = vmatpush1.bf16.msra.mxu1 %v1134_v57  ;;  %v1174_v57 = vld [vmem:[#allocation8 + $0x38] sm:$0xff]  }
  0x80   :  { %669 = vmatprep.subr.bf16.mxu1 %v1135_v58  ;;  %v311_v58 = vld [vmem:[%s1434_s4] sm:$0x3] }
  0x81   :  { %703 = vmatpush1.bf16.msra.mxu0 %v1125_v55  ;;  %v1172_v55 = vld [vmem:[#allocation8 + $0x30] sm:$0xff]  }
  0x82   :  { %704 = vmatprep.subr.bf16.mxu0 %v1133_v56  ;;  %v1173_v56 = vld [vmem:[#allocation8 + $0x78] sm:$0xff]  }
  0x83   :  { %670 = vmatpush1.bf16.msra.mxu1 %v1140_v61 }
  0x84   :  { %671 = vmatprep.subr.bf16.mxu1 %v1141_v63 }
  0x85   :  { %705 = vmatpush1.bf16.msra.mxu0 %v1131_v59 }
  0x86   :  { %706 = vmatprep.subr.bf16.mxu0 %v1139_v60 }
  0x87   :  { %672 = vmatpush1.bf16.msra.mxu1 %v1146_v2 }
  0x88   :  { %673 = vmatprep.subr.bf16.mxu1 %v1147_v3 }
  0x89   :  { %707 = vmatpush1.bf16.msra.mxu0 %v1137_v62  ;;  %v316_v62 = vrot.slane %v311_v58, %v95_v14 }
  0x8a   :  { %708 = vmatprep.subr.bf16.mxu0 %v1145_v0  ;;  %v320_v0 = vrot.slane %v311_v58, %v99_v16 }
  0x8b   :  { %674 = vmatpush1.bf16.msra.mxu1 %v1152_v6 }
  0x8c   :  { %1013 = vmatprep.subr.bf16.mxu1 %v1159_v11 }
  0x8d   :  { %709 = vmatpush1.bf16.msra.mxu0 %v1143_v1 }
  0x8e   :  { %710 = vmatprep.subr.bf16.mxu0 %v1151_v4 }
  0x91   :  { %711 = vmatpush1.bf16.msra.mxu0 %v1149_v5 }
  0x92   :  { %712 = vmatprep.subr.bf16.mxu0 %v1155_v7 }
  0x95   :  { %713 = vmatpush1.bf16.msra.mxu0 %v1153_v8 }
  0x96   :  { %714 = vmatprep.subr.bf16.mxu0 %v1158_v9 }
  0x99   :  { %715 = vmatpush1.bf16.msra.mxu0 %v1156_v10 }
 0x127   :  { %v191_v19 = vpop.f32.mrb[0].mxu0 }
 0x128   :  { %v192_v20 = vadd.f32 %v191_v19, %v96_v17  ;;  %v193_v21 = vpop.f32.mrb[1].mxu0 }
 0x129   :  { %v194_v23 = vadd.f32 %v193_v21, %v100_v18  ;;  %v195_v24 = vpop.f32.mrb[2].mxu0 }
 0x12a   :  { %v239_v26 = vmax.f32 %v192_v20, 0.0  ;;  %v196_v27 = vpop.f32.mrb[3].mxu0 }
 0x12b   :  { %v240_v28 = vmax.f32 %v194_v23, 0.0 }
 0x12c   :  { %v243_v33 = vpack.c.bf16 %v239_v26, %v239_v26 }
 0x12d   :  { %v244_v30 = vpack.c.bf16 %v240_v28, %v240_v28 }
 0x12f   :  { %v232_v35 = vpop.f32.mrb[4].mxu0  ;;  %675 = vmatprep.mubr.bf16.mxu1 %v244_v30 }
 0x130   :  { %v233_v36 = vadd.f32 %v232_v35, %v104_v29  ;;  %v234_v37 = vpop.f32.mrb[5].mxu0  ;;  %676 = vmatmul.mubr.bf16.vlgmr.msra.gmra.mrb[0].mxu1 %v243_v33 }
 0x131   :  { %v235_v38 = vadd.f32 %v234_v37, %v108_v31  ;;  %v236_v39 = vpop.f32.mrb[6].mxu0  ;;  %1014 = vmatpush3.bf16.msra.mxu1 %v1160_v32 }
 0x132   :  { %v241_v41 = vmax.f32 %v233_v36, 0.0  ;;  %v237_v42 = vpop.f32.mrb[7].mxu0  ;;  %1015 = vmatprep.subr.bf16.mxu1 %v1161_v34 }
 0x133   :  { %v242_v44 = vmax.f32 %v235_v38, 0.0 }
 0x134   :  { %v245_v47 = vpack.c.bf16 %v241_v41, %v241_v41 }
 0x135   :  { %v246_v45 = vpack.c.bf16 %v242_v44, %v242_v44  ;;  %1016 = vmatpush3.bf16.msra.mxu1 %v1162_v40 }
 0x136   :  { %1017 = vmatprep.subr.bf16.mxu1 %v1163_v43 }
 0x137   :  { %716 = vmatprep.mubr.bf16.mxu0 %v246_v45 }
 0x138   :  { %717 = vmatmul.mubr.bf16.vlgmr.msra.gmra.mrb[8].mxu0 %v245_v47 }
 0x139   :  { %1018 = vmatpush3.bf16.msra.mxu1 %v1164_v46 }
 0x13a   :  { %1019 = vmatprep.subr.bf16.mxu1 %v1165_v48 }
 0x13d   :  { %1020 = vmatpush3.bf16.msra.mxu1 %v1166_v49 }
 0x13e   :  { %1021 = vmatprep.subr.bf16.mxu1 %v1167_v50 }
 0x141   :  { %1022 = vmatpush3.bf16.msra.mxu1 %v1168_v51 }
 0x142   :  { %1023 = vmatprep.subr.bf16.mxu1 %v1169_v52 }
 0x145   :  { %1024 = vmatpush3.bf16.msra.mxu1 %v1170_v53 }
 0x146   :  { %1025 = vmatprep.subr.bf16.mxu1 %v1171_v54 }
 0x149   :  { %1026 = vmatpush3.bf16.msra.mxu1 %v1172_v55 }
 0x14a   :  { %1027 = vmatprep.subr.bf16.mxu1 %v1173_v56 }
 0x14d   :  { %1028 = vmatpush3.bf16.msra.mxu1 %v1174_v57 }
 0x203   :  { %v677_v59 = vpop.f32.mrb[0].mxu1 }
 0x204   :  { %v679_v60 = vpop.f32.mrb[1].mxu1  ;;  %v678_v1 = vadd.f32 %v677_v59, %v316_v62 }
 0x205   :  { %v681_v61 = vpop.f32.mrb[2].mxu1  ;;  %v680_v2 = vadd.f32 %v679_v60, %v320_v0 }
 0x206   :  { %v682_v63 = vpop.f32.mrb[3].mxu1 }
 0x20b   :  { %v718_v3 = vpop.f32.mrb[8].mxu0 }
 0x20c   :  { %v719_v4 = vadd.f32 %v718_v3, %v678_v1  ;;  %v720_v5 = vpop.f32.mrb[9].mxu0 }
 0x20d   :  { %v721_v6 = vadd.f32 %v720_v5, %v680_v2  ;;  %v722_v7 = vpop.f32.mrb[10].mxu0 }
 0x20e   :  { %v725_v8 = vmax.f32 %v719_v4, 0.0  ;;  %v723_v9 = vpop.f32.mrb[11].mxu0 }
 0x20f   :  { %v726_v10 = vmax.f32 %v721_v6, 0.0 }
 0x210   :  { %v727_v12 = vpack.c.bf16 %v725_v8, %v725_v8 }
 0x211   :  { %v728_v11 = vpack.c.bf16 %v726_v10, %v726_v10 }
 0x213   :  { %896 = vmatprep.mubr.bf16.mxu1 %v728_v11 }
 0x214   :  { %897 = vmatmul.mubr.bf16.vlgmr.msra.gmra.mrb[4].mxu1 %v727_v12 }
 0x2e7   :  { %v1029_v15 = vpop.f32.mrb[4].mxu1 }
 0x2e8   :  { %v1030_v14 = vpop.f32.mrb[5].mxu1 }
 0x2e9   :  { %v1031_v16 = vadd.f32 %v1030_v14, %v1029_v15  ;;  %v1032_v17 = vpop.f32.mrb[6].mxu1 }
 0x2ea   :  { %v1033_v18 = vpop.f32.mrb[7].mxu1 }
 0x2eb   :  { %v899_v19 = vadd.f32 %v1031_v16, %v996_v13 }
 0x2ed   :  { %904 = vst [vmem:[#allocation10] sm:$0xff] %v899_v19 }
 0x2ee   :  { %1274 = shalt.err (!%p1271_p8)
}
 0x2ef   :  { %s1275_s6 = scalar_lea.hbm %s1437_s7, 128 }
 0x2f0   :  { %p1276_p9 = scmp.ne.s32.totalorder %s1437_s7, %s1275_s6  ;;  %p1279_p10 = scmp.lt.u32.totalorder %s1275_s6, %s1437_s7 }
 0x2f2   :  { %p1281_p11 = pnand %p1279_p10, %p1276_p9 }
 0x2f4   :  { %1284 = shalt.err (!%p1281_p11)
}
 0x2f5   :  { %914 = dma.vmem_to_hbm [thread:$0]  %s912_s9, 128, %s1437_s7, [#allocation4]  }
 0x2f6   :  { %1291 = dma.done.wait [#allocation4], 128  }
 0x2f7   :  { %1292 = vsyncadd [#allocation4], 4294967168 }
 0x2f8   :  { %918 = vsyncpa [#allocation3], 1 }
 0x2f9   :  { %919 = vsyncpa [#allocation6], 1 }
 0x2fa   :  { %920 = vsyncpa [#allocation9], 1 }
 0x2fb   :  { %921 = vsyncpa [#allocation4], 1 }

</bundles_post_ra>
